<compile_context>
chip_gen: v6e
topology: v6e:2x2x1
jax: 0.10.0
libtpu: 0.0.40
codegen_flags: <defaults>
</compile_context>

<pallas_src>
import jax
import jax.numpy as jnp
from jax.experimental import pallas as pl
from jax.experimental.pallas import tpu as pltpu


# ---------------------------------------------------------------------------
# Hardware profile (generation-aware sizing)
# ---------------------------------------------------------------------------
def _tpu_profile():
    vmem = None
    try:
        vmem = int(pltpu.get_tpu_info().vmem_capacity_bytes)
    except Exception:
        vmem = None
    kind = ""
    try:
        kind = jax.devices()[0].device_kind.lower()
    except Exception:
        pass
    if vmem is None:
        if "v7" in kind:
            vmem = 64 << 20
        elif any(g in kind for g in ("v5", "v6")):
            vmem = 128 << 20
        else:
            vmem = 64 << 20                      # conservative default
    is_v5e = ("v5e" in kind) or ("v5 lite" in kind) or ("v5litepod" in kind)
    big_vmem = vmem >= (96 << 20)                # v5e/v6e: 128 MiB; v7x: 64 MiB
    return dict(
        vmem_bytes=vmem,
        is_v5e=is_v5e,
        target_tile_bytes=(12 << 20) if big_vmem else (4 << 20),
        vmem_soft_cap=(96 << 20) if big_vmem else (48 << 20),
        kron_weight_bytes=(8 << 20) if big_vmem else (4 << 20),
    )


# ---------------------------------------------------------------------------
# Kernels
# ---------------------------------------------------------------------------
def _kron_kernel(x_ref, w_ref, b_ref, o_ref):
    # x_ref: (Bblk, T*F)  flattened batch rows (lane-dense last dim)
    # w_ref: (T*F, T*F)   tril(W)^T (x) I_F, pre-masked, in matmul dtype
    # b_ref: (1, T*F)     bias broadcast over F, f32
    # o_ref: (Bblk, T*F)
    x = x_ref[...]
    y = jnp.dot(x.astype(w_ref.dtype), w_ref[...],
                preferred_element_type=jnp.float32)
    o_ref[...] = (y + b_ref[...] + x.astype(jnp.float32)).astype(o_ref.dtype)


def _rowtile_kernel(x_ref, w_ref, b_ref, o_ref):
    # Fallback for very large T*F: one lane-dense (Tt, T) @ (T, F) matmul per
    # batch element. The residual is folded into the weight (W + I), so no
    # in-kernel slicing is needed.  Grid = (T//Tt, B) with batch innermost so
    # the W row-tile stays resident in VMEM across the inner batch loop.
    # x_ref: (1, T, F); w_ref: (Tt, T) = tril(W)+I tile; b_ref: (Tt, 1); o_ref: (1, Tt, F)
    y = jnp.dot(w_ref[...], x_ref[0].astype(w_ref.dtype),
                preferred_element_type=jnp.float32)            # (Tt, F)
    o_ref[0] = (y + b_ref[...]).astype(o_ref.dtype)


# ---------------------------------------------------------------------------
# Tiling helpers
# ---------------------------------------------------------------------------
def _ceil_to(v, m):
    return ((v + m - 1) // m) * m


def _sublane_rows(itemsize):
    # Rows per packed sublane group: f32 -> 8, bf16 -> 16, int8/fp8 -> 32.
    return {4: 8, 2: 16, 1: 32}.get(int(itemsize), 8)


def _pick_bblk(batch, row_bytes, itemsize, target_tile_bytes):
    """Batch rows per grid step.

    Priorities: (1) >= 8 grid steps when the batch allows (>= 4 per TensorCore
    on v7x) so DMA-in / MXU / DMA-out actually overlap; (2) even step counts
    for the v7x megacore split; (3) the per-tile VMEM budget; (4) sublane-
    packed row alignment for the dtype.
    """
    sub = _sublane_rows(itemsize)
    max_bblk = max(sub, (target_tile_bytes // max(1, row_bytes)) // sub * sub)

    max_steps = pl.cdiv(batch, sub)
    steps = min(8, max_steps)
    if steps > 1 and steps % 2 and steps + 1 <= max_steps:
        steps += 1
    bblk = min(max_bblk, _ceil_to(pl.cdiv(batch, max(steps, 1)), sub))

    steps = pl.cdiv(batch, bblk)            # re-balance if VMEM capped the block
    if 1 < steps < 16 and steps % 2 and pl.cdiv(batch, sub) > steps:
        bblk = max(sub, _ceil_to(pl.cdiv(batch, steps + 1), sub))

    if bblk >= batch:
        bblk = batch                        # full-dim block: legal for any size
    return int(bblk)


def _pick_ttile(T, w_itemsize, budget):
    tt = T
    while tt * T * w_itemsize > budget and tt % 2 == 0 and (tt // 2) % 8 == 0:
        tt //= 2
    return tt


# ---------------------------------------------------------------------------
# Factory: precompute weights once, cache compiled calls per (B, F, dtype)
# ---------------------------------------------------------------------------
def make_linear_block(weight, bias, *, clm_mask=True, matmul_dtype=None):
    """weight: (T, T, 1) conv weight; bias: (T,). Returns forward(x)."""
    prof = _tpu_profile()
    T = int(weight.shape[0])

    w2d = weight[:, :, 0].astype(jnp.float32)
    if clm_mask:
        w2d = jnp.tril(w2d)                 # mask once, in the wrapper

    if matmul_dtype is None:
        # bf16 operands on v5e keep the F-inflated Kron matmul off the MXU
        # roofline; everywhere else keep the input precision (f32 accumulate).
        matmul_dtype = jnp.bfloat16 if prof["is_v5e"] else jnp.float32
    matmul_dtype = jnp.dtype(matmul_dtype)

    bias_f32 = bias.astype(jnp.float32)
    b2d = bias_f32.reshape(T, 1)

    kron_cache = {}       # F -> (wk, bias_flat)
    fb_cache = {}         # () -> (tril(W)+I) in matmul dtype
    call_cache = {}       # (path, B, F, dtype) -> compiled pallas_call callable

    def _kron_weight(F):
        key = int(F)
        if key not in kron_cache:
            wk = jnp.kron(w2d.T, jnp.eye(F, dtype=jnp.float32)).astype(matmul_dtype)
            bf = jnp.repeat(bias_f32, F).reshape(1, T * F)
            kron_cache[key] = (wk, bf)
        return kron_cache[key]

    def _fb_weight():
        if "w" not in fb_cache:
            fb_cache["w"] = (w2d + jnp.eye(T, dtype=jnp.float32)).astype(matmul_dtype)
        return fb_cache["w"]

    # ---- Kron (lane-dense) path builder ---------------------------------
    def _build_kron_call(B, F, x_dtype, optimized):
        TF = T * F
        itemsize = jnp.dtype(x_dtype).itemsize
        bblk = _pick_bblk(B, TF * itemsize, itemsize, prof["target_tile_bytes"])
        steps = pl.cdiv(B, bblk)
        grid = (steps,)

        tile_bytes = bblk * TF * itemsize
        wk_bytes = TF * TF * matmul_dtype.itemsize
        need = 3 * tile_bytes + 2 * tile_bytes + 2 * wk_bytes + 2 * TF * 4 + (4 << 20)
        vmem_limit = int(min(prof["vmem_soft_cap"], max(24 << 20, need)))

        x_kwargs, w_kwargs = {}, {}
        if optimized:
            # Constant-index weight/bias: single buffer (no re-DMA needed).
            w_kwargs = dict(pipeline_mode=pl.Buffered(1))
            # Deeper x pipeline only when there are enough steps to fill it.
            if steps >= 3:
                x_kwargs = dict(pipeline_mode=pl.Buffered(3))

        cost = pl.CostEstimate(
            flops=int(2 * B * T * T * F),            # mathematical, not Kron-inflated
            transcendentals=0,
            bytes_accessed=int(2 * B * TF * itemsize + wk_bytes + TF * 4))

        return pl.pallas_call(
            _kron_kernel,
            out_shape=jax.ShapeDtypeStruct((B, TF), x_dtype),
            grid_spec=pltpu.PrefetchScalarGridSpec(
                num_scalar_prefetch=0,
                grid=grid,
                in_specs=[
                    pl.BlockSpec((bblk, TF), lambda i: (i, 0), **x_kwargs),
                    pl.BlockSpec((TF, TF), lambda i: (0, 0), **w_kwargs),
                    pl.BlockSpec((1, TF), lambda i: (0, 0), **w_kwargs),
                ],
                out_specs=pl.BlockSpec((bblk, TF), lambda i: (i, 0)),
            ),
            compiler_params=pltpu.CompilerParams(
                dimension_semantics=("parallel",),
                vmem_limit_bytes=vmem_limit),
            cost_estimate=cost,
        )

    # ---- Row-tile fallback builder (very large T*F) ----------------------
    def _build_rowtile_call(B, F, x_dtype):
        itemsize = jnp.dtype(x_dtype).itemsize
        tt = _pick_ttile(T, matmul_dtype.itemsize, prof["kron_weight_bytes"])
        nT = T // tt
        grid = (nT, B)                        # batch innermost: W tile stays resident

        need = (2 * T * F * itemsize + 2 * tt * T * matmul_dtype.itemsize
                + 2 * tt * F * itemsize + 2 * T * 4 + (4 << 20))
        vmem_limit = int(min(prof["vmem_soft_cap"], max(24 << 20, need)))

        cost = pl.CostEstimate(
            flops=int(2 * B * T * T * F),
            transcendentals=0,
            bytes_accessed=int(2 * B * T * F * itemsize
                               + T * T * matmul_dtype.itemsize))

        return pl.pallas_call(
            _rowtile_kernel,
            out_shape=jax.ShapeDtypeStruct((B, T, F), x_dtype),
            grid_spec=pltpu.PrefetchScalarGridSpec(
                num_scalar_prefetch=0,
                grid=grid,
                in_specs=[
                    pl.BlockSpec((1, T, F), lambda ti, b: (b, 0, 0)),
                    pl.BlockSpec((tt, T), lambda ti, b: (ti, 0)),
                    pl.BlockSpec((tt, 1), lambda ti, b: (ti, 0)),
                ],
                out_specs=pl.BlockSpec((1, tt, F), lambda ti, b: (b, ti, 0)),
            ),
            compiler_params=pltpu.CompilerParams(
                dimension_semantics=("parallel", "parallel"),
                vmem_limit_bytes=vmem_limit),
            cost_estimate=cost,
        )

    # ---- Forward ----------------------------------------------------------
    def forward(x, force_fallback=False):
        orig_shape = x.shape
        if x.ndim > 3:
            x = x.reshape((-1,) + x.shape[-2:])
        B, T_in, F = x.shape
        assert T_in == T, f"expected sequence length {T}, got {T_in}"
        TF = T * F

        use_kron = (not force_fallback) and (
            TF * TF * matmul_dtype.itemsize <= prof["kron_weight_bytes"])
        key = ("kron" if use_kron else "row", int(B), int(F), str(jnp.dtype(x.dtype)))

        if use_kron:
            wk, bf = _kron_weight(F)
            xf = x.reshape(B, TF)
            if key in call_cache:
                out = call_cache[key](xf, wk, bf)
            else:
                try:
                    fn = _build_kron_call(B, F, x.dtype, optimized=True)
                    out = fn(xf, wk, bf)          # eager: compile errors caught here
                    call_cache[key] = fn
                except Exception:
                    fn = _build_kron_call(B, F, x.dtype, optimized=False)
                    out = fn(xf, wk, bf)
                    call_cache[key] = fn
            out = out.reshape(B, T, F)
        else:
            if key not in call_cache:
                call_cache[key] = _build_rowtile_call(B, F, x.dtype)
            out = call_cache[key](x, _fb_weight(), b2d)

        return out.reshape(orig_shape)

    forward.matmul_dtype = matmul_dtype
    return forward


def linear_block_forward(x, weight, bias, clm_mask=True, matmul_dtype=None):
    """One-shot convenience wrapper (prefer make_linear_block for reuse)."""
    return make_linear_block(weight, bias, clm_mask=clm_mask,
                             matmul_dtype=matmul_dtype)(x)


# ---------------------------------------------------------------------------
# Demo / self-check
# ---------------------------------------------------------------------------
if __name__ == "__main__":
    T, F = 8, 32                                    # length (tokens), dim (features)
    key = jax.random.PRNGKey(0)
    kx, kw, kb, kx4 = jax.random.split(key, 4)

    bound = 1.0 / (T ** 0.5)
    weight = jax.random.uniform(kw, (T, T, 1), minval=-bound, maxval=bound,
                                dtype=jnp.float32)
    bias = jax.random.uniform(kb, (T,), minval=-bound, maxval=bound,
                              dtype=jnp.float32)
    w_masked = jnp.tril(weight[:, :, 0])

    block = make_linear_block(weight, bias, clm_mask=True)
    # Tolerance depends on the auto-selected MXU operand dtype (bf16 on v5e).
    if block.matmul_dtype == jnp.dtype(jnp.bfloat16):
        atol, rtol = 2e-2, 2e-2
    else:
        atol, rtol = 1e-4, 1e-4

    # 3-D input (b t f) — Kron (lane-dense) path
    B = 2
    x = jax.random.normal(kx, (B, T, F), dtype=jnp.float32)
    out = jax.block_until_ready(block(x))
    ref = (jnp.einsum("ts,bsf->btf", w_masked, x, precision="highest")
           + bias[None, :, None] + x)
    assert out.shape == x.shape
    assert jnp.allclose(out, ref, atol=atol, rtol=rtol)

    # 4-D input (b p t f) -> flattened internally, output restored to 4-D
    x4 = jax.random.normal(kx4, (2, 2, T, F), dtype=jnp.float32)
    out4 = jax.block_until_ready(block(x4))
    ref4 = (jnp.einsum("ts,bpsf->bptf", w_masked, x4, precision="highest")
            + bias[None, None, :, None] + x4)
    assert out4.shape == x4.shape
    assert jnp.allclose(out4, ref4, atol=atol, rtol=rtol)

    # Row-tile fallback path (used automatically when T*F is too large for the
    # Kron weight) — exercised here at small shape to verify it compiles.
    out_fb = jax.block_until_ready(block(x, force_fallback=True))
    assert jnp.allclose(out_fb, ref, atol=atol, rtol=rtol)

    print("KERNEL_OK")
</pallas_src>

<mosaic_0001>
module attributes {stable_mosaic.version = 11 : i64} {
  func.func @_kron_kernel(%arg0: i32, %arg1: memref<2x256xf32, #tpu.memory_space<vmem>>, %arg2: memref<256x256xf32, #tpu.memory_space<vmem>>, %arg3: memref<1x256xf32, #tpu.memory_space<vmem>>, %arg4: memref<2x256xf32, #tpu.memory_space<vmem>>) attributes {dimension_semantics = [#tpu.dimension_semantics<parallel>], iteration_bounds = array<i64: 1>, scalar_prefetch = 0 : i64, scratch_operands = 0 : i64, tpu.core_type = #tpu.core_type<tc>, window_params = [{transform_indices = @transform_0, window_bounds = array<i64: 2, 256>}, {pipeline_mode = #tpu.pipeline_mode<synchronous>, transform_indices = @transform_1, window_bounds = array<i64: 256, 256>}, {pipeline_mode = #tpu.pipeline_mode<synchronous>, transform_indices = @transform_2, window_bounds = array<i64: 1, 256>}, {transform_indices = @transform_3, window_bounds = array<i64: 2, 256>}]} {
    %c0 = arith.constant 0 : index
    %c0_0 = arith.constant 0 : index
    %0 = vector.load %arg1[%c0, %c0_0] : memref<2x256xf32, #tpu.memory_space<vmem>>, vector<2x256xf32>
    %c0_1 = arith.constant 0 : index
    %c0_2 = arith.constant 0 : index
    %1 = vector.load %arg2[%c0_1, %c0_2] : memref<256x256xf32, #tpu.memory_space<vmem>>, vector<256x256xf32>
    %cst = arith.constant dense<0.000000e+00> : vector<2x256xf32>
    %2 = tpu.matmul %0, %1, %cst {dimension_numbers = #tpu.dot_dimension_numbers<[1], [0], [0], [1], [0, 0, 1, 1], [], []>} : vector<2x256xf32>, vector<256x256xf32>, vector<2x256xf32> -> vector<2x256xf32>
    %c0_3 = arith.constant 0 : index
    %c0_4 = arith.constant 0 : index
    %3 = vector.load %arg3[%c0_3, %c0_4] : memref<1x256xf32, #tpu.memory_space<vmem>>, vector<1x256xf32>
    %4 = vector.broadcast %3 : vector<1x256xf32> to vector<2x256xf32>
    %5 = arith.addf %2, %4 : vector<2x256xf32>
    %6 = arith.addf %5, %0 : vector<2x256xf32>
    %c0_5 = arith.constant 0 : index
    %c0_6 = arith.constant 0 : index
    %7 = vector.load %arg4[%c0_5, %c0_6] : memref<2x256xf32, #tpu.memory_space<vmem>>, vector<2x256xf32>
    tpu.vector_store %arg4[%c0_5, %c0_6], %6 {strides = array<i32>} : memref<2x256xf32, #tpu.memory_space<vmem>>, vector<2x256xf32>,
    return
  }
  func.func @transform_0(%arg0: i32) -> (i32, i32) {
    %c0_i32 = arith.constant 0 : i32
    %c0_i32_0 = arith.constant 0 : i32
    return %arg0, %c0_i32 : i32, i32
  }
  func.func @transform_1(%arg0: i32) -> (i32, i32) {
    %c0_i32 = arith.constant 0 : i32
    %c0_i32_0 = arith.constant 0 : i32
    %c0_i32_1 = arith.constant 0 : i32
    return %c0_i32, %c0_i32_0 : i32, i32
  }
  func.func @transform_2(%arg0: i32) -> (i32, i32) {
    %c0_i32 = arith.constant 0 : i32
    %c0_i32_0 = arith.constant 0 : i32
    %c0_i32_1 = arith.constant 0 : i32
    return %c0_i32, %c0_i32_0 : i32, i32
  }
  func.func @transform_3(%arg0: i32) -> (i32, i32) {
    %c0_i32 = arith.constant 0 : i32
    %c0_i32_0 = arith.constant 0 : i32
    return %arg0, %c0_i32 : i32, i32
  }
}

module attributes {stable_mosaic.version = 11 : i64} {
  func.func @_kron_kernel(%arg0: i32, %arg1: memref<2x256xf32, #tpu.memory_space<vmem>>, %arg2: memref<256x256xf32, #tpu.memory_space<vmem>>, %arg3: memref<1x256xf32, #tpu.memory_space<vmem>>, %arg4: memref<2x256xf32, #tpu.memory_space<vmem>>) attributes {dimension_semantics = [#tpu.dimension_semantics<parallel>], iteration_bounds = array<i64: 1>, scalar_prefetch = 0 : i64, scratch_operands = 0 : i64, tpu.core_type = #tpu.core_type<tc>, window_params = [{transform_indices = @transform_0, window_bounds = array<i64: 2, 256>}, {pipeline_mode = #tpu.pipeline_mode<synchronous>, transform_indices = @transform_1, window_bounds = array<i64: 256, 256>}, {pipeline_mode = #tpu.pipeline_mode<synchronous>, transform_indices = @transform_2, window_bounds = array<i64: 1, 256>}, {transform_indices = @transform_3, window_bounds = array<i64: 2, 256>}]} {
    %c0 = arith.constant 0 : index
    %c0_0 = arith.constant 0 : index
    %0 = vector.load %arg1[%c0, %c0_0] : memref<2x256xf32, #tpu.memory_space<vmem>>, vector<2x256xf32>
    %c0_1 = arith.constant 0 : index
    %c0_2 = arith.constant 0 : index
    %1 = vector.load %arg2[%c0_1, %c0_2] : memref<256x256xf32, #tpu.memory_space<vmem>>, vector<256x256xf32>
    %cst = arith.constant dense<0.000000e+00> : vector<2x256xf32>
    %2 = tpu.matmul %0, %1, %cst {dimension_numbers = #tpu.dot_dimension_numbers<[1], [0], [0], [1], [0, 0, 1, 1], [], []>} : vector<2x256xf32>, vector<256x256xf32>, vector<2x256xf32> -> vector<2x256xf32>
    %c0_3 = arith.constant 0 : index
    %c0_4 = arith.constant 0 : index
    %3 = vector.load %arg3[%c0_3, %c0_4] : memref<1x256xf32, #tpu.memory_space<vmem>>, vector<1x256xf32>
    %4 = vector.broadcast %3 : vector<1x256xf32> to vector<2x256xf32>
    %5 = arith.addf %2, %4 : vector<2x256xf32>
    %6 = arith.addf %5, %0 : vector<2x256xf32>
    %c0_5 = arith.constant 0 : index
    %c0_6 = arith.constant 0 : index
    %7 = vector.load %arg4[%c0_5, %c0_6] : memref<2x256xf32, #tpu.memory_space<vmem>>, vector<2x256xf32>
    tpu.vector_store %arg4[%c0_5, %c0_6], %6 {strides = array<i32>} : memref<2x256xf32, #tpu.memory_space<vmem>>, vector<2x256xf32>,
    return
  }
  func.func @transform_0(%arg0: i32) -> (i32, i32) {
    %c0_i32 = arith.constant 0 : i32
    %c0_i32_0 = arith.constant 0 : i32
    return %arg0, %c0_i32 : i32, i32
  }
  func.func @transform_1(%arg0: i32) -> (i32, i32) {
    %c0_i32 = arith.constant 0 : i32
    %c0_i32_0 = arith.constant 0 : i32
    %c0_i32_1 = arith.constant 0 : i32
    return %c0_i32, %c0_i32_0 : i32, i32
  }
  func.func @transform_2(%arg0: i32) -> (i32, i32) {
    %c0_i32 = arith.constant 0 : i32
    %c0_i32_0 = arith.constant 0 : i32
    %c0_i32_1 = arith.constant 0 : i32
    return %c0_i32, %c0_i32_0 : i32, i32
  }
  func.func @transform_3(%arg0: i32) -> (i32, i32) {
    %c0_i32 = arith.constant 0 : i32
    %c0_i32_0 = arith.constant 0 : i32
    return %arg0, %c0_i32 : i32, i32
  }
}

</mosaic_0001>

<bundles_post_ra>
// kernel: tpu_custom_call.1
= control target key start
LH: loop header
LB: loop body
LE: loop exit
PB: predicated region body
PF: predicated region fallthrough
CT: control target
= control target key end

     0   :  { %8 = vsyncpa [#allocation3], 0  ;;  %s350_s0 = inlined_call_operand.hbm [shape: f32[2,256], index: 0, kind: input, shape index: {}]   ;;  %s351_s1 = inlined_call_operand.hbm [shape: f32[256,256], index: 1, kind: input, shape index: {}]   ;;  %s352_s2 = inlined_call_operand.vmem [shape: f32[1,256], index: 2, kind: input, shape index: {}]   ;;  %s353_s3 = inlined_call_operand.hbm [shape: f32[2,256], index: 3, kind: output, shape index: {}]  }
   0x1   :  { %9 = vsyncpa [#allocation6], 0 }
   0x2   :  { %10 = vsyncpa [#allocation4], 0  ;;  %s303_s12 = smov [#allocation2]   ;;  %s304_s14 = smov [#allocation5]  }
   0x3   :  { %s17_s13 = sshll.u32 %s303_s12, 4  ;;  %s26_s15 = sshll.u32 %s304_s14, 4  ;;  %s18_s13 = int_to_ptr.vmem [resolvable:$true] %s17_s13  ;;  %s27_s15 = int_to_ptr.vmem [resolvable:$true] %s26_s15 }
   0x4   :  { %s245_s16 = scalar_lea.vmem %s18_s13, 64  ;;  %p250_p1 = scmp.lt.s32.totalorder %s18_s13, %s18_s13 }
   0x5   :  { %p246_p0 = scmp.ne.s32.totalorder %s18_s13, %s245_s16  ;;  %p251_p2 = scmp.lt.s32.totalorder %s245_s16, %s245_s16 }
   0x7   :  { %p252_p3 = por %p251_p2, %p250_p1 }
   0x9   :  { %p253_p4 = pnand %p252_p3, %p246_p0 }
   0xb   :  { %256 = shalt.err (!%p253_p4)
}
   0xc   :  { %20 = dma.hbm_to_vmem [thread:$0]  %s350_s0, 64, %s18_s13, [#allocation3]  }
   0xd   :  { %s265_s19 = scalar_lea.vmem %s27_s15, 8192  ;;  %p270_p6 = scmp.lt.s32.totalorder %s27_s15, %s27_s15 }
   0xe   :  { %p266_p5 = scmp.ne.s32.totalorder %s27_s15, %s265_s19  ;;  %p271_p7 = scmp.lt.s32.totalorder %s265_s19, %s265_s19 }
  0x10   :  { %p272_p8 = por %p271_p7, %p270_p6 }
  0x12   :  { %p273_p9 = pnand %p272_p8, %p266_p5 }
  0x14   :  { %276 = shalt.err (!%p273_p9)
}
  0x15   :  { %s305_s20 = smov 256   ;;  %s306_s21 = smov 16  }
  0x16   :  { %32 = dma.hbm_to_vmem [thread:$0]  %s351_s1, 8192, %s27_s15, [#allocation6], %s305_s20, %s305_s20, %s306_s21  }
  0x17   :  { %297 = dma.done.wait [#allocation3], 64  }
  0x18   :  { %298 = vsyncadd [#allocation3], 4294967232 }
  0x19   :  { %299 = dma.done.wait [#allocation6], 8192  }
  0x1a   :  { %300 = vsyncadd [#allocation6], 4294959104  ;;  %v73_v0 = vld [vmem:[#allocation5 + $0xf8] sm:$0xff]  ;;  %v72_v1 = vld [vmem:[#allocation5 + $0xf0] sm:$0xff]  ;;  %s307_s24 = smov [#allocation7]  }
  0x1b   :  { %v71_v2 = vld [vmem:[#allocation5 + $0xe8] sm:$0xff]  ;;  %129 = vmatprep.subr.mxu0 %v73_v0  ;;  %v70_v3 = vld [vmem:[#allocation5 + $0xe0] sm:$0xff]  ;;  %v69_v4 = vld [vmem:[#allocation5 + $0xd8] sm:$0xff]  ;;  %s220_s25 = sshll.u32 %s307_s24, 4  ;;  %s221_s25 = int_to_ptr.vmem [resolvable:$true] %s220_s25 }
  0x1c   :  { %130 = vmatpush1.msra.mxu0 %v72_v1  ;;  %v68_v5 = vld [vmem:[#allocation5 + $0xd0] sm:$0xff]  ;;  %v67_v6 = vld [vmem:[#allocation5 + $0xc8] sm:$0xff]  ;;  %v66_v7 = vld [vmem:[#allocation5 + $0xc0] sm:$0xff]  ;;  %s277_s26 = scalar_lea.vmem %s221_s25, 64  ;;  %p282_p11 = scmp.lt.s32.totalorder %s221_s25, %s221_s25 }
  0x1d   :  { %131 = vmatprep.subr.mxu0 %v71_v2  ;;  %v65_v8 = vld [vmem:[#allocation5 + $0xb8] sm:$0xff]  ;;  %v64_v9 = vld [vmem:[#allocation5 + $0xb0] sm:$0xff]  ;;  %v63_v10 = vld [vmem:[#allocation5 + $0xa8] sm:$0xff]  ;;  %v108_v2 = vlaneseq  ;;  %p278_p10 = scmp.ne.s32.totalorder %s221_s25, %s277_s26  ;;  %p283_p12 = scmp.lt.s32.totalorder %s277_s26, %s277_s26 }
  0x1e   :  { %132 = vmatpush1.msra.mxu0 %v70_v3  ;;  %v62_v11 = vld [vmem:[#allocation5 + $0xa0] sm:$0xff]  ;;  %v61_v12 = vld [vmem:[#allocation5 + $0x98] sm:$0xff]  ;;  %v60_v13 = vld [vmem:[#allocation5 + $0x90] sm:$0xff] }
  0x1f   :  { %133 = vmatprep.subr.mxu0 %v69_v4  ;;  %v59_v14 = vld [vmem:[#allocation5 + $0x88] sm:$0xff]  ;;  %v58_v15 = vld [vmem:[#allocation5 + $0x80] sm:$0xff]  ;;  %v57_v16 = vld [vmem:[#allocation5 + $0x78] sm:$0xff]  ;;  %v109_v3 = vshrl.u32 %v108_v2, 7  ;;  %p284_p13 = por %p283_p12, %p282_p11 }
  0x20   :  { %134 = vmatpush1.msra.mxu0 %v68_v5  ;;  %v56_v17 = vld [vmem:[#allocation5 + $0x70] sm:$0xff]  ;;  %v55_v18 = vld [vmem:[#allocation5 + $0x68] sm:$0xff]  ;;  %v54_v19 = vld [vmem:[#allocation5 + $0x60] sm:$0xff] }
  0x21   :  { %135 = vmatprep.subr.mxu0 %v67_v6  ;;  %v53_v20 = vld [vmem:[#allocation5 + $0x58] sm:$0xff]  ;;  %v52_v21 = vld [vmem:[#allocation5 + $0x50] sm:$0xff]  ;;  %v51_v22 = vld [vmem:[#allocation5 + $0x48] sm:$0xff]  ;;  %v110_v4 = vsub.s32 0, %v109_v3  ;;  %v114_v6 = vsub.s32 1, %v109_v3  ;;  %p285_p0 = pnand %p284_p13, %p278_p10 }
  0x22   :  { %136 = vmatpush1.msra.mxu0 %v66_v7  ;;  %v50_v23 = vld [vmem:[#allocation5 + $0x40] sm:$0xff]  ;;  %v334_v24 = vld.sshfl [vmem:[#allocation2] sm:$0x33 pattern:$0x76325410]  ;;  %v48_v27 = vld [vmem:[#allocation5 + $0x30] sm:$0xff] }
  0x23   :  { %137 = vmatprep.subr.mxu0 %v65_v8  ;;  %v49_v25 = vld [vmem:[#allocation5 + $0x38] sm:$0xff]  ;;  %v338_v26 = vcombine.high %v334_v24, %v334_v24  ;;  %v47_v28 = vld [vmem:[#allocation5 + $0x28] sm:$0xff]  ;;  %v46_v29 = vld [vmem:[#allocation5 + $0x20] sm:$0xff] }
  0x24   :  { %138 = vmatpush1.msra.mxu0 %v64_v9  ;;  %v45_v30 = vld [vmem:[#allocation5 + $0x18] sm:$0xff]  ;;  %v44_v31 = vld [vmem:[#allocation5 + $0x10] sm:$0xff]  ;;  %v43_v32 = vld [vmem:[#allocation5 + $0x8] sm:$0xff] }
  0x25   :  { %139 = vmatprep.subr.mxu0 %v63_v10  ;;  %193 = vmatprep.mubr.f32.mxu0 %v338_v26  ;;  %v42_v33 = vld [vmem:[#allocation5] sm:$0xff]  ;;  %v105_v34 = vld [vmem:[#allocation5 + $0x1f8] sm:$0xff]  ;;  %v104_v35 = vld [vmem:[#allocation5 + $0x1f0] sm:$0xff] }
  0x26   :  { %140 = vmatpush1.msra.mxu0 %v62_v11  ;;  %v103_v36 = vld [vmem:[#allocation5 + $0x1e8] sm:$0xff]  ;;  %v102_v37 = vld [vmem:[#allocation5 + $0x1e0] sm:$0xff]  ;;  %v101_v38 = vld [vmem:[#allocation5 + $0x1d8] sm:$0xff] }
  0x27   :  { %141 = vmatprep.subr.mxu0 %v61_v12  ;;  %v100_v39 = vld [vmem:[#allocation5 + $0x1d0] sm:$0xff]  ;;  %v99_v40 = vld [vmem:[#allocation5 + $0x1c8] sm:$0xff]  ;;  %v98_v41 = vld [vmem:[#allocation5 + $0x1c0] sm:$0xff] }
  0x28   :  { %142 = vmatpush1.msra.mxu0 %v60_v13  ;;  %v97_v42 = vld [vmem:[#allocation5 + $0x1b8] sm:$0xff]  ;;  %v96_v43 = vld [vmem:[#allocation5 + $0x1b0] sm:$0xff]  ;;  %v95_v44 = vld [vmem:[#allocation5 + $0x1a8] sm:$0xff] }
  0x29   :  { %143 = vmatprep.subr.mxu0 %v59_v14  ;;  %v94_v45 = vld [vmem:[#allocation5 + $0x1a0] sm:$0xff]  ;;  %v93_v46 = vld [vmem:[#allocation5 + $0x198] sm:$0xff]  ;;  %v92_v47 = vld [vmem:[#allocation5 + $0x190] sm:$0xff] }
  0x2a   :  { %144 = vmatpush1.msra.mxu0 %v58_v15  ;;  %v91_v48 = vld [vmem:[#allocation5 + $0x188] sm:$0xff]  ;;  %v90_v49 = vld [vmem:[#allocation5 + $0x180] sm:$0xff]  ;;  %v89_v50 = vld [vmem:[#allocation5 + $0x178] sm:$0xff] }
  0x2b   :  { %145 = vmatprep.subr.mxu0 %v57_v16  ;;  %v88_v51 = vld [vmem:[#allocation5 + $0x170] sm:$0xff]  ;;  %v87_v52 = vld [vmem:[#allocation5 + $0x168] sm:$0xff]  ;;  %v86_v53 = vld [vmem:[#allocation5 + $0x160] sm:$0xff] }
  0x2c   :  { %146 = vmatpush1.msra.mxu0 %v56_v17  ;;  %v85_v54 = vld [vmem:[#allocation5 + $0x158] sm:$0xff]  ;;  %v84_v55 = vld [vmem:[#allocation5 + $0x150] sm:$0xff]  ;;  %v83_v56 = vld [vmem:[#allocation5 + $0x148] sm:$0xff] }
  0x2d   :  { %147 = vmatprep.subr.mxu0 %v55_v18  ;;  %v82_v57 = vld [vmem:[#allocation5 + $0x140] sm:$0xff]  ;;  %v81_v58 = vld [vmem:[#allocation5 + $0x138] sm:$0xff]  ;;  %v80_v59 = vld [vmem:[#allocation5 + $0x130] sm:$0xff] }
  0x2e   :  { %148 = vmatpush1.msra.mxu0 %v54_v19  ;;  %v79_v60 = vld [vmem:[#allocation5 + $0x128] sm:$0xff]  ;;  %v78_v61 = vld [vmem:[#allocation5 + $0x120] sm:$0xff]  ;;  %v77_v62 = vld [vmem:[#allocation5 + $0x118] sm:$0xff] }
  0x2f   :  { %149 = vmatprep.subr.mxu0 %v53_v20  ;;  %v76_v63 = vld [vmem:[#allocation5 + $0x110] sm:$0xff]  ;;  %v75_v0 = vld [vmem:[#allocation5 + $0x108] sm:$0xff]  ;;  %v74_v1 = vld [vmem:[#allocation5 + $0x100] sm:$0xff] }
  0x30   :  { %150 = vmatpush1.msra.mxu0 %v52_v21  ;;  %v106_v5 = vld [vmem:[%s352_s2] sm:$0x3] }
  0x31   :  { %151 = vmatprep.subr.mxu0 %v51_v22  ;;  %v111_v7 = vrot.slane %v106_v5, %v110_v4  ;;  %v115_v8 = vrot.slane %v106_v5, %v114_v6 }
  0x32   :  { %152 = vmatpush1.msra.mxu0 %v50_v23 }
  0x33   :  { %153 = vmatprep.subr.mxu0 %v49_v25 }
  0x34   :  { %154 = vmatpush1.msra.mxu0 %v48_v27 }
  0x35   :  { %155 = vmatprep.subr.mxu0 %v47_v28 }
  0x36   :  { %156 = vmatpush1.msra.mxu0 %v46_v29 }
  0x37   :  { %157 = vmatprep.subr.mxu0 %v45_v30 }
  0x38   :  { %158 = vmatpush1.msra.mxu0 %v44_v31 }
  0x39   :  { %159 = vmatprep.subr.mxu0 %v43_v32 }
  0x3a   :  { %160 = vmatpush1.msra.mxu0 %v42_v33 }
  0x3b   :  { %161 = vmatprep.subr.mxu0 %v105_v34 }
  0x3c   :  { %162 = vmatpush2.msra.mxu0 %v104_v35 }
  0x3d   :  { %163 = vmatprep.subr.mxu0 %v103_v36 }
  0x3e   :  { %164 = vmatpush2.msra.mxu0 %v102_v37 }
  0x3f   :  { %165 = vmatprep.subr.mxu0 %v101_v38 }
  0x40   :  { %166 = vmatpush2.msra.mxu0 %v100_v39 }
  0x41   :  { %167 = vmatprep.subr.mxu0 %v99_v40 }
  0x42   :  { %168 = vmatpush2.msra.mxu0 %v98_v41 }
  0x43   :  { %169 = vmatprep.subr.mxu0 %v97_v42 }
  0x44   :  { %170 = vmatpush2.msra.mxu0 %v96_v43 }
  0x45   :  { %171 = vmatprep.subr.mxu0 %v95_v44 }
  0x46   :  { %172 = vmatpush2.msra.mxu0 %v94_v45 }
  0x47   :  { %173 = vmatprep.subr.mxu0 %v93_v46 }
  0x48   :  { %174 = vmatpush2.msra.mxu0 %v92_v47 }
  0x49   :  { %175 = vmatprep.subr.mxu0 %v91_v48 }
  0x4a   :  { %176 = vmatpush2.msra.mxu0 %v90_v49 }
  0x4b   :  { %177 = vmatprep.subr.mxu0 %v89_v50 }
  0x4c   :  { %178 = vmatpush2.msra.mxu0 %v88_v51 }
  0x4d   :  { %179 = vmatprep.subr.mxu0 %v87_v52 }
  0x4e   :  { %180 = vmatpush2.msra.mxu0 %v86_v53 }
  0x4f   :  { %181 = vmatprep.subr.mxu0 %v85_v54 }
  0x50   :  { %182 = vmatpush2.msra.mxu0 %v84_v55 }
  0x51   :  { %183 = vmatprep.subr.mxu0 %v83_v56 }
  0x52   :  { %184 = vmatpush2.msra.mxu0 %v82_v57 }
  0x53   :  { %185 = vmatprep.subr.mxu0 %v81_v58 }
  0x54   :  { %186 = vmatpush2.msra.mxu0 %v80_v59 }
  0x55   :  { %187 = vmatprep.subr.mxu0 %v79_v60 }
  0x56   :  { %188 = vmatpush2.msra.mxu0 %v78_v61 }
  0x57   :  { %189 = vmatprep.subr.mxu0 %v77_v62 }
  0x58   :  { %190 = vmatpush2.msra.mxu0 %v76_v63 }
  0x59   :  { %191 = vmatprep.subr.mxu0 %v75_v0 }
  0x5a   :  { %192 = vmatpush2.msra.mxu0 %v74_v1 }
  0x5b   :  { %194 = vmatmul.mubr.f32.vlgmr.msra.gmra.mxu0 %v334_v24 }
 0x11b   :  { %v195_v9 = vpop.f32.mrf.mxu0 }
 0x11c   :  { %v196_v10 = vadd.f32 %v195_v9, %v111_v7 }
 0x11d   :  { %v197_v11 = vpop.f32.mrf.mxu0 }
 0x11e   :  { %v198_v12 = vadd.f32 %v197_v11, %v115_v8  ;;  %v200_v13 = vadd.f32 %v334_v24, %v196_v10 }
 0x120   :  { %v201_v14 = vadd.f32 %v198_v12, %v338_v26 }
 0x122   :  { %v204_v15 = vcombine.low %v200_v13, %v201_v14 }
 0x124   :  { %231 = vst.sshfl [vmem:[#allocation7] sm:$0x33 pattern:$0x76325410] %v204_v15 }
 0x125   :  { %288 = shalt.err (!%p285_p0)
}
 0x126   :  { %223 = dma.vmem_to_hbm [thread:$0]  %s221_s25, 64, %s353_s3, [#allocation4]  }
 0x127   :  { %301 = dma.done.wait [#allocation4], 64  }
 0x128   :  { %302 = vsyncadd [#allocation4], 4294967232 }
 0x129   :  { %227 = vsyncpa [#allocation3], 1 }
 0x12a   :  { %228 = vsyncpa [#allocation6], 1 }
 0x12b   :  { %229 = vsyncpa [#allocation4], 1 }

// kernel: tpu_custom_call.1
= control target key start
LH: loop header
LB: loop body
LE: loop exit
PB: predicated region body
PF: predicated region fallthrough
CT: control target
= control target key end

     0   :  { %8 = vsyncpa [#allocation3], 0  ;;  %s350_s0 = inlined_call_operand.hbm [shape: f32[2,256], index: 0, kind: input, shape index: {}]   ;;  %s351_s1 = inlined_call_operand.hbm [shape: f32[256,256], index: 1, kind: input, shape index: {}]   ;;  %s352_s2 = inlined_call_operand.vmem [shape: f32[1,256], index: 2, kind: input, shape index: {}]   ;;  %s353_s3 = inlined_call_operand.hbm [shape: f32[2,256], index: 3, kind: output, shape index: {}]  }
   0x1   :  { %9 = vsyncpa [#allocation6], 0 }
   0x2   :  { %10 = vsyncpa [#allocation4], 0  ;;  %s303_s12 = smov [#allocation2]   ;;  %s304_s14 = smov [#allocation5]  }
   0x3   :  { %s17_s13 = sshll.u32 %s303_s12, 4  ;;  %s26_s15 = sshll.u32 %s304_s14, 4  ;;  %s18_s13 = int_to_ptr.vmem [resolvable:$true] %s17_s13  ;;  %s27_s15 = int_to_ptr.vmem [resolvable:$true] %s26_s15 }
   0x4   :  { %s245_s16 = scalar_lea.vmem %s18_s13, 64  ;;  %p250_p1 = scmp.lt.s32.totalorder %s18_s13, %s18_s13 }
   0x5   :  { %p246_p0 = scmp.ne.s32.totalorder %s18_s13, %s245_s16  ;;  %p251_p2 = scmp.lt.s32.totalorder %s245_s16, %s245_s16 }
   0x7   :  { %p252_p3 = por %p251_p2, %p250_p1 }
   0x9   :  { %p253_p4 = pnand %p252_p3, %p246_p0 }
   0xb   :  { %256 = shalt.err (!%p253_p4)
}
   0xc   :  { %20 = dma.hbm_to_vmem [thread:$0]  %s350_s0, 64, %s18_s13, [#allocation3]  }
   0xd   :  { %s265_s19 = scalar_lea.vmem %s27_s15, 8192  ;;  %p270_p6 = scmp.lt.s32.totalorder %s27_s15, %s27_s15 }
   0xe   :  { %p266_p5 = scmp.ne.s32.totalorder %s27_s15, %s265_s19  ;;  %p271_p7 = scmp.lt.s32.totalorder %s265_s19, %s265_s19 }
  0x10   :  { %p272_p8 = por %p271_p7, %p270_p6 }
  0x12   :  { %p273_p9 = pnand %p272_p8, %p266_p5 }
  0x14   :  { %276 = shalt.err (!%p273_p9)
}
  0x15   :  { %s305_s20 = smov 256   ;;  %s306_s21 = smov 16  }
  0x16   :  { %32 = dma.hbm_to_vmem [thread:$0]  %s351_s1, 8192, %s27_s15, [#allocation6], %s305_s20, %s305_s20, %s306_s21  }
  0x17   :  { %297 = dma.done.wait [#allocation3], 64  }
  0x18   :  { %298 = vsyncadd [#allocation3], 4294967232 }
  0x19   :  { %299 = dma.done.wait [#allocation6], 8192  }
  0x1a   :  { %300 = vsyncadd [#allocation6], 4294959104  ;;  %v73_v0 = vld [vmem:[#allocation5 + $0xf8] sm:$0xff]  ;;  %v72_v1 = vld [vmem:[#allocation5 + $0xf0] sm:$0xff]  ;;  %s307_s24 = smov [#allocation7]  }
  0x1b   :  { %v71_v2 = vld [vmem:[#allocation5 + $0xe8] sm:$0xff]  ;;  %129 = vmatprep.subr.mxu0 %v73_v0  ;;  %v70_v3 = vld [vmem:[#allocation5 + $0xe0] sm:$0xff]  ;;  %v69_v4 = vld [vmem:[#allocation5 + $0xd8] sm:$0xff]  ;;  %s220_s25 = sshll.u32 %s307_s24, 4  ;;  %s221_s25 = int_to_ptr.vmem [resolvable:$true] %s220_s25 }
  0x1c   :  { %130 = vmatpush1.msra.mxu0 %v72_v1  ;;  %v68_v5 = vld [vmem:[#allocation5 + $0xd0] sm:$0xff]  ;;  %v67_v6 = vld [vmem:[#allocation5 + $0xc8] sm:$0xff]  ;;  %v66_v7 = vld [vmem:[#allocation5 + $0xc0] sm:$0xff]  ;;  %s277_s26 = scalar_lea.vmem %s221_s25, 64  ;;  %p282_p11 = scmp.lt.s32.totalorder %s221_s25, %s221_s25 }
  0x1d   :  { %131 = vmatprep.subr.mxu0 %v71_v2  ;;  %v65_v8 = vld [vmem:[#allocation5 + $0xb8] sm:$0xff]  ;;  %v64_v9 = vld [vmem:[#allocation5 + $0xb0] sm:$0xff]  ;;  %v63_v10 = vld [vmem:[#allocation5 + $0xa8] sm:$0xff]  ;;  %v108_v2 = vlaneseq  ;;  %p278_p10 = scmp.ne.s32.totalorder %s221_s25, %s277_s26  ;;  %p283_p12 = scmp.lt.s32.totalorder %s277_s26, %s277_s26 }
  0x1e   :  { %132 = vmatpush1.msra.mxu0 %v70_v3  ;;  %v62_v11 = vld [vmem:[#allocation5 + $0xa0] sm:$0xff]  ;;  %v61_v12 = vld [vmem:[#allocation5 + $0x98] sm:$0xff]  ;;  %v60_v13 = vld [vmem:[#allocation5 + $0x90] sm:$0xff] }
  0x1f   :  { %133 = vmatprep.subr.mxu0 %v69_v4  ;;  %v59_v14 = vld [vmem:[#allocation5 + $0x88] sm:$0xff]  ;;  %v58_v15 = vld [vmem:[#allocation5 + $0x80] sm:$0xff]  ;;  %v57_v16 = vld [vmem:[#allocation5 + $0x78] sm:$0xff]  ;;  %v109_v3 = vshrl.u32 %v108_v2, 7  ;;  %p284_p13 = por %p283_p12, %p282_p11 }
  0x20   :  { %134 = vmatpush1.msra.mxu0 %v68_v5  ;;  %v56_v17 = vld [vmem:[#allocation5 + $0x70] sm:$0xff]  ;;  %v55_v18 = vld [vmem:[#allocation5 + $0x68] sm:$0xff]  ;;  %v54_v19 = vld [vmem:[#allocation5 + $0x60] sm:$0xff] }
  0x21   :  { %135 = vmatprep.subr.mxu0 %v67_v6  ;;  %v53_v20 = vld [vmem:[#allocation5 + $0x58] sm:$0xff]  ;;  %v52_v21 = vld [vmem:[#allocation5 + $0x50] sm:$0xff]  ;;  %v51_v22 = vld [vmem:[#allocation5 + $0x48] sm:$0xff]  ;;  %v110_v4 = vsub.s32 0, %v109_v3  ;;  %v114_v6 = vsub.s32 1, %v109_v3  ;;  %p285_p0 = pnand %p284_p13, %p278_p10 }
  0x22   :  { %136 = vmatpush1.msra.mxu0 %v66_v7  ;;  %v50_v23 = vld [vmem:[#allocation5 + $0x40] sm:$0xff]  ;;  %v334_v24 = vld.sshfl [vmem:[#allocation2] sm:$0x33 pattern:$0x76325410]  ;;  %v48_v27 = vld [vmem:[#allocation5 + $0x30] sm:$0xff] }
  0x23   :  { %137 = vmatprep.subr.mxu0 %v65_v8  ;;  %v49_v25 = vld [vmem:[#allocation5 + $0x38] sm:$0xff]  ;;  %v338_v26 = vcombine.high %v334_v24, %v334_v24  ;;  %v47_v28 = vld [vmem:[#allocation5 + $0x28] sm:$0xff]  ;;  %v46_v29 = vld [vmem:[#allocation5 + $0x20] sm:$0xff] }
  0x24   :  { %138 = vmatpush1.msra.mxu0 %v64_v9  ;;  %v45_v30 = vld [vmem:[#allocation5 + $0x18] sm:$0xff]  ;;  %v44_v31 = vld [vmem:[#allocation5 + $0x10] sm:$0xff]  ;;  %v43_v32 = vld [vmem:[#allocation5 + $0x8] sm:$0xff] }
  0x25   :  { %139 = vmatprep.subr.mxu0 %v63_v10  ;;  %193 = vmatprep.mubr.f32.mxu0 %v338_v26  ;;  %v42_v33 = vld [vmem:[#allocation5] sm:$0xff]  ;;  %v105_v34 = vld [vmem:[#allocation5 + $0x1f8] sm:$0xff]  ;;  %v104_v35 = vld [vmem:[#allocation5 + $0x1f0] sm:$0xff] }
  0x26   :  { %140 = vmatpush1.msra.mxu0 %v62_v11  ;;  %v103_v36 = vld [vmem:[#allocation5 + $0x1e8] sm:$0xff]  ;;  %v102_v37 = vld [vmem:[#allocation5 + $0x1e0] sm:$0xff]  ;;  %v101_v38 = vld [vmem:[#allocation5 + $0x1d8] sm:$0xff] }
  0x27   :  { %141 = vmatprep.subr.mxu0 %v61_v12  ;;  %v100_v39 = vld [vmem:[#allocation5 + $0x1d0] sm:$0xff]  ;;  %v99_v40 = vld [vmem:[#allocation5 + $0x1c8] sm:$0xff]  ;;  %v98_v41 = vld [vmem:[#allocation5 + $0x1c0] sm:$0xff] }
  0x28   :  { %142 = vmatpush1.msra.mxu0 %v60_v13  ;;  %v97_v42 = vld [vmem:[#allocation5 + $0x1b8] sm:$0xff]  ;;  %v96_v43 = vld [vmem:[#allocation5 + $0x1b0] sm:$0xff]  ;;  %v95_v44 = vld [vmem:[#allocation5 + $0x1a8] sm:$0xff] }
  0x29   :  { %143 = vmatprep.subr.mxu0 %v59_v14  ;;  %v94_v45 = vld [vmem:[#allocation5 + $0x1a0] sm:$0xff]  ;;  %v93_v46 = vld [vmem:[#allocation5 + $0x198] sm:$0xff]  ;;  %v92_v47 = vld [vmem:[#allocation5 + $0x190] sm:$0xff] }
  0x2a   :  { %144 = vmatpush1.msra.mxu0 %v58_v15  ;;  %v91_v48 = vld [vmem:[#allocation5 + $0x188] sm:$0xff]  ;;  %v90_v49 = vld [vmem:[#allocation5 + $0x180] sm:$0xff]  ;;  %v89_v50 = vld [vmem:[#allocation5 + $0x178] sm:$0xff] }
  0x2b   :  { %145 = vmatprep.subr.mxu0 %v57_v16  ;;  %v88_v51 = vld [vmem:[#allocation5 + $0x170] sm:$0xff]  ;;  %v87_v52 = vld [vmem:[#allocation5 + $0x168] sm:$0xff]  ;;  %v86_v53 = vld [vmem:[#allocation5 + $0x160] sm:$0xff] }
  0x2c   :  { %146 = vmatpush1.msra.mxu0 %v56_v17  ;;  %v85_v54 = vld [vmem:[#allocation5 + $0x158] sm:$0xff]  ;;  %v84_v55 = vld [vmem:[#allocation5 + $0x150] sm:$0xff]  ;;  %v83_v56 = vld [vmem:[#allocation5 + $0x148] sm:$0xff] }
  0x2d   :  { %147 = vmatprep.subr.mxu0 %v55_v18  ;;  %v82_v57 = vld [vmem:[#allocation5 + $0x140] sm:$0xff]  ;;  %v81_v58 = vld [vmem:[#allocation5 + $0x138] sm:$0xff]  ;;  %v80_v59 = vld [vmem:[#allocation5 + $0x130] sm:$0xff] }
  0x2e   :  { %148 = vmatpush1.msra.mxu0 %v54_v19  ;;  %v79_v60 = vld [vmem:[#allocation5 + $0x128] sm:$0xff]  ;;  %v78_v61 = vld [vmem:[#allocation5 + $0x120] sm:$0xff]  ;;  %v77_v62 = vld [vmem:[#allocation5 + $0x118] sm:$0xff] }
  0x2f   :  { %149 = vmatprep.subr.mxu0 %v53_v20  ;;  %v76_v63 = vld [vmem:[#allocation5 + $0x110] sm:$0xff]  ;;  %v75_v0 = vld [vmem:[#allocation5 + $0x108] sm:$0xff]  ;;  %v74_v1 = vld [vmem:[#allocation5 + $0x100] sm:$0xff] }
  0x30   :  { %150 = vmatpush1.msra.mxu0 %v52_v21  ;;  %v106_v5 = vld [vmem:[%s352_s2] sm:$0x3] }
  0x31   :  { %151 = vmatprep.subr.mxu0 %v51_v22  ;;  %v111_v7 = vrot.slane %v106_v5, %v110_v4  ;;  %v115_v8 = vrot.slane %v106_v5, %v114_v6 }
  0x32   :  { %152 = vmatpush1.msra.mxu0 %v50_v23 }
  0x33   :  { %153 = vmatprep.subr.mxu0 %v49_v25 }
  0x34   :  { %154 = vmatpush1.msra.mxu0 %v48_v27 }
  0x35   :  { %155 = vmatprep.subr.mxu0 %v47_v28 }
  0x36   :  { %156 = vmatpush1.msra.mxu0 %v46_v29 }
  0x37   :  { %157 = vmatprep.subr.mxu0 %v45_v30 }
  0x38   :  { %158 = vmatpush1.msra.mxu0 %v44_v31 }
  0x39   :  { %159 = vmatprep.subr.mxu0 %v43_v32 }
  0x3a   :  { %160 = vmatpush1.msra.mxu0 %v42_v33 }
  0x3b   :  { %161 = vmatprep.subr.mxu0 %v105_v34 }
  0x3c   :  { %162 = vmatpush2.msra.mxu0 %v104_v35 }
  0x3d   :  { %163 = vmatprep.subr.mxu0 %v103_v36 }
  0x3e   :  { %164 = vmatpush2.msra.mxu0 %v102_v37 }
  0x3f   :  { %165 = vmatprep.subr.mxu0 %v101_v38 }
  0x40   :  { %166 = vmatpush2.msra.mxu0 %v100_v39 }
  0x41   :  { %167 = vmatprep.subr.mxu0 %v99_v40 }
  0x42   :  { %168 = vmatpush2.msra.mxu0 %v98_v41 }
  0x43   :  { %169 = vmatprep.subr.mxu0 %v97_v42 }
  0x44   :  { %170 = vmatpush2.msra.mxu0 %v96_v43 }
  0x45   :  { %171 = vmatprep.subr.mxu0 %v95_v44 }
  0x46   :  { %172 = vmatpush2.msra.mxu0 %v94_v45 }
  0x47   :  { %173 = vmatprep.subr.mxu0 %v93_v46 }
  0x48   :  { %174 = vmatpush2.msra.mxu0 %v92_v47 }
  0x49   :  { %175 = vmatprep.subr.mxu0 %v91_v48 }
  0x4a   :  { %176 = vmatpush2.msra.mxu0 %v90_v49 }
  0x4b   :  { %177 = vmatprep.subr.mxu0 %v89_v50 }
  0x4c   :  { %178 = vmatpush2.msra.mxu0 %v88_v51 }
  0x4d   :  { %179 = vmatprep.subr.mxu0 %v87_v52 }
  0x4e   :  { %180 = vmatpush2.msra.mxu0 %v86_v53 }
  0x4f   :  { %181 = vmatprep.subr.mxu0 %v85_v54 }
  0x50   :  { %182 = vmatpush2.msra.mxu0 %v84_v55 }
  0x51   :  { %183 = vmatprep.subr.mxu0 %v83_v56 }
  0x52   :  { %184 = vmatpush2.msra.mxu0 %v82_v57 }
  0x53   :  { %185 = vmatprep.subr.mxu0 %v81_v58 }
  0x54   :  { %186 = vmatpush2.msra.mxu0 %v80_v59 }
  0x55   :  { %187 = vmatprep.subr.mxu0 %v79_v60 }
  0x56   :  { %188 = vmatpush2.msra.mxu0 %v78_v61 }
  0x57   :  { %189 = vmatprep.subr.mxu0 %v77_v62 }
  0x58   :  { %190 = vmatpush2.msra.mxu0 %v76_v63 }
  0x59   :  { %191 = vmatprep.subr.mxu0 %v75_v0 }
  0x5a   :  { %192 = vmatpush2.msra.mxu0 %v74_v1 }
  0x5b   :  { %194 = vmatmul.mubr.f32.vlgmr.msra.gmra.mxu0 %v334_v24 }
 0x11b   :  { %v195_v9 = vpop.f32.mrf.mxu0 }
 0x11c   :  { %v196_v10 = vadd.f32 %v195_v9, %v111_v7 }
 0x11d   :  { %v197_v11 = vpop.f32.mrf.mxu0 }
 0x11e   :  { %v198_v12 = vadd.f32 %v197_v11, %v115_v8  ;;  %v200_v13 = vadd.f32 %v334_v24, %v196_v10 }
 0x120   :  { %v201_v14 = vadd.f32 %v198_v12, %v338_v26 }
 0x122   :  { %v204_v15 = vcombine.low %v200_v13, %v201_v14 }
 0x124   :  { %231 = vst.sshfl [vmem:[#allocation7] sm:$0x33 pattern:$0x76325410] %v204_v15 }
 0x125   :  { %288 = shalt.err (!%p285_p0)
}
 0x126   :  { %223 = dma.vmem_to_hbm [thread:$0]  %s221_s25, 64, %s353_s3, [#allocation4]  }
 0x127   :  { %301 = dma.done.wait [#allocation4], 64  }
 0x128   :  { %302 = vsyncadd [#allocation4], 4294967232 }
 0x129   :  { %227 = vsyncpa [#allocation3], 1 }
 0x12a   :  { %228 = vsyncpa [#allocation6], 1 }
 0x12b   :  { %229 = vsyncpa [#allocation4], 1 }

</bundles_post_ra>
